<compile_context>
chip_gen: v7x
topology: tpu7x:2x2x1
jax: 0.10.0
libtpu: 0.0.40
codegen_flags: <defaults>
</compile_context>

<pallas_src>
import jax
import jax.numpy as jnp
from jax.experimental import pallas as pl
from jax.experimental.pallas import tpu as pltpu

IN_FEATURES = 28 * 28          # 784
HIDDEN = 512
OUT_FEATURES = 10
OUT_PAD = 128                  # lane-dense output slab
TM_MAX = 1024                  # max batch-tile rows (working set ~10 MB VMEM)


def _round_up(x, m):
    return (x + m - 1) // m * m


def _choose_tiling(batch):
    """Even tile split; tiles 8-row aligned; >=2 steps for big batches (v7x)."""
    n_tiles = max(1, -(-batch // TM_MAX))
    if n_tiles == 1 and batch >= 512:
        n_tiles = 2                      # let v7x megacore split the grid
    tm = _round_up(-(-batch // n_tiles), 8)
    b_pad = n_tiles * tm
    return tm, b_pad, n_tiles


def _mlp_kernel(x_ref, w1_ref, b1_ref, w2_ref, b2_ref, out_ref):
    # x_ref:  (TM, 784) f32      w1_ref: (784, 512) bf16   b1_ref: (1, 512) f32
    # w2_ref: (512, 128) bf16    b2_ref: (1, 128)   f32    out_ref: (TM, 128) f32
    x = x_ref[...].astype(jnp.bfloat16)
    h = jnp.dot(x, w1_ref[...],
                preferred_element_type=jnp.float32) + b1_ref[...]
    # Sigmoid via a single EUP transcendental: sigmoid(h) = 0.5*tanh(0.5*h)+0.5
    h = 0.5 * jnp.tanh(0.5 * h) + 0.5
    logits = jnp.dot(h.astype(jnp.bfloat16), w2_ref[...],
                     preferred_element_type=jnp.float32) + b2_ref[...]
    out_ref[...] = logits.astype(out_ref.dtype)


def prepare_params(w1, b1, w2, b2):
    """One-time weight prep (hoisted out of the per-call path).

    w1: (784, 512), b1: (512,), w2: (512, 10), b2: (10,)  -- all f32,
    stored as (in, out) so the kernel computes x @ W (== x @ W_pt.T).
    """
    w1_p = w1.astype(jnp.bfloat16)                                   # (784, 512)
    b1_p = b1.reshape(1, HIDDEN).astype(jnp.float32)                 # (1, 512)
    w2_p = (jnp.zeros((HIDDEN, OUT_PAD), jnp.float32)
            .at[:, :OUT_FEATURES].set(w2)).astype(jnp.bfloat16)      # (512, 128)
    b2_p = (jnp.zeros((1, OUT_PAD), jnp.float32)
            .at[0, :OUT_FEATURES].set(b2))                           # (1, 128)
    return w1_p, b1_p, w2_p, b2_p


def neural_network_forward(x_nchw, w1_p, b1_p, w2_p, b2_p):
    """x_nchw: (B, 1, 28, 28) f32 + prepared params -> logits (B, 10) f32."""
    B = x_nchw.shape[0]

    # nn.Flatten(start_dim=1): pure metadata reshape, no copy.
    x2d = x_nchw.reshape(B, IN_FEATURES)

    tm, b_pad, n_tiles = _choose_tiling(B)
    if b_pad != B:
        x2d = jnp.pad(x2d, ((0, b_pad - B), (0, 0)))

    out_padded = pl.pallas_call(
        _mlp_kernel,
        out_shape=jax.ShapeDtypeStruct((b_pad, OUT_PAD), jnp.float32),
        grid=(n_tiles,),
        in_specs=[
            pl.BlockSpec((tm, IN_FEATURES), lambda i: (i, 0)),       # x tile
            pl.BlockSpec((IN_FEATURES, HIDDEN), lambda i: (0, 0)),   # w1 (resident)
            pl.BlockSpec((1, HIDDEN), lambda i: (0, 0)),             # b1 (resident)
            pl.BlockSpec((HIDDEN, OUT_PAD), lambda i: (0, 0)),       # w2 (resident)
            pl.BlockSpec((1, OUT_PAD), lambda i: (0, 0)),            # b2 (resident)
        ],
        out_specs=pl.BlockSpec((tm, OUT_PAD), lambda i: (i, 0)),
        compiler_params=pltpu.CompilerParams(
            dimension_semantics=("parallel",),
        ),
    )(x2d, w1_p, b1_p, w2_p, b2_p)

    # Slice away batch padding and the output-lane padding.
    return out_padded[:B, :OUT_FEATURES]


def init_params(key):
    """Deterministic PyTorch-style init: U(-1/sqrt(fan_in), 1/sqrt(fan_in))."""
    k1, k2, k3, k4 = jax.random.split(key, 4)
    bound1 = 1.0 / jnp.sqrt(float(IN_FEATURES))
    bound2 = 1.0 / jnp.sqrt(float(HIDDEN))
    w1 = jax.random.uniform(k1, (IN_FEATURES, HIDDEN), jnp.float32, -bound1, bound1)
    b1 = jax.random.uniform(k2, (HIDDEN,), jnp.float32, -bound1, bound1)
    w2 = jax.random.uniform(k3, (HIDDEN, OUT_FEATURES), jnp.float32, -bound2, bound2)
    b2 = jax.random.uniform(k4, (OUT_FEATURES,), jnp.float32, -bound2, bound2)
    return w1, b1, w2, b2


if __name__ == "__main__":
    key = jax.random.PRNGKey(0)
    k_x, k_p = jax.random.split(key)

    # Small batch of MNIST-shaped inputs, NCHW.
    x = jax.random.normal(k_x, (2, 1, 28, 28), dtype=jnp.float32)
    w1, b1, w2, b2 = init_params(k_p)

    # One-time weight prep, then jit the forward.
    params = prepare_params(w1, b1, w2, b2)
    fwd = jax.jit(neural_network_forward)
    logits = fwd(x, *params)
    jax.block_until_ready(logits)

    # Pure-JAX f32 reference of the same math (kernel runs bf16 -> looser tol).
    x2d = x.reshape(2, -1)
    ref = (1.0 / (1.0 + jnp.exp(-(x2d @ w1 + b1)))) @ w2 + b2
    assert logits.shape == (2, OUT_FEATURES)
    assert jnp.allclose(logits, ref, atol=3e-2, rtol=3e-2), (
        jnp.max(jnp.abs(logits - ref)))

    print("KERNEL_OK")
</pallas_src>

<mosaic_0001>
module attributes {stable_mosaic.version = 11 : i64} {
  func.func @_mlp_kernel(%arg0: i32, %arg1: memref<8x784xf32, #tpu.memory_space<vmem>>, %arg2: memref<784x512xbf16, #tpu.memory_space<vmem>>, %arg3: memref<1x512xf32, #tpu.memory_space<vmem>>, %arg4: memref<512x128xbf16, #tpu.memory_space<vmem>>, %arg5: memref<1x128xf32, #tpu.memory_space<vmem>>, %arg6: memref<8x128xf32, #tpu.memory_space<vmem>>) attributes {dimension_semantics = [#tpu.dimension_semantics<parallel>], iteration_bounds = array<i64: 1>, scalar_prefetch = 0 : i64, scratch_operands = 0 : i64, tpu.core_type = #tpu.core_type<tc>, window_params = [{transform_indices = @transform_0, window_bounds = array<i64: 8, 784>}, {pipeline_mode = #tpu.pipeline_mode<synchronous>, transform_indices = @transform_1, window_bounds = array<i64: 784, 512>}, {pipeline_mode = #tpu.pipeline_mode<synchronous>, transform_indices = @transform_2, window_bounds = array<i64: 1, 512>}, {pipeline_mode = #tpu.pipeline_mode<synchronous>, transform_indices = @transform_3, window_bounds = array<i64: 512, 128>}, {pipeline_mode = #tpu.pipeline_mode<synchronous>, transform_indices = @transform_4, window_bounds = array<i64: 1, 128>}, {transform_indices = @transform_5, window_bounds = array<i64: 8, 128>}]} {
    %c0 = arith.constant 0 : index
    %c0_0 = arith.constant 0 : index
    %0 = vector.load %arg1[%c0, %c0_0] : memref<8x784xf32, #tpu.memory_space<vmem>>, vector<8x784xf32>
    %1 = arith.truncf %0 : vector<8x784xf32> to vector<8x784xbf16>
    %c0_1 = arith.constant 0 : index
    %c0_2 = arith.constant 0 : index
    %2 = vector.load %arg2[%c0_1, %c0_2] : memref<784x512xbf16, #tpu.memory_space<vmem>>, vector<784x512xbf16>
    %cst = arith.constant dense<0.000000e+00> : vector<8x512xf32>
    %3 = tpu.matmul %1, %2, %cst {dimension_numbers = #tpu.dot_dimension_numbers<[1], [0], [0], [1], [0, 0, 1, 1], [], []>} : vector<8x784xbf16>, vector<784x512xbf16>, vector<8x512xf32> -> vector<8x512xf32>
    %c0_3 = arith.constant 0 : index
    %c0_4 = arith.constant 0 : index
    %4 = vector.load %arg3[%c0_3, %c0_4] : memref<1x512xf32, #tpu.memory_space<vmem>>, vector<1x512xf32>
    %5 = vector.broadcast %4 : vector<1x512xf32> to vector<8x512xf32>
    %6 = arith.addf %3, %5 : vector<8x512xf32>
    %cst_5 = arith.constant 5.000000e-01 : f32
    %7 = vector.broadcast %cst_5 : f32 to vector<8x512xf32>
    %8 = arith.mulf %7, %6 : vector<8x512xf32>
    %9 = math.tanh %8 : vector<8x512xf32>
    %cst_6 = arith.constant 5.000000e-01 : f32
    %10 = vector.broadcast %cst_6 : f32 to vector<8x512xf32>
    %11 = arith.mulf %10, %9 : vector<8x512xf32>
    %cst_7 = arith.constant 5.000000e-01 : f32
    %12 = vector.broadcast %cst_7 : f32 to vector<8x512xf32>
    %13 = arith.addf %11, %12 : vector<8x512xf32>
    %14 = arith.truncf %13 : vector<8x512xf32> to vector<8x512xbf16>
    %c0_8 = arith.constant 0 : index
    %c0_9 = arith.constant 0 : index
    %15 = vector.load %arg4[%c0_8, %c0_9] : memref<512x128xbf16, #tpu.memory_space<vmem>>, vector<512x128xbf16>
    %cst_10 = arith.constant dense<0.000000e+00> : vector<8x128xf32>
    %16 = tpu.matmul %14, %15, %cst_10 {dimension_numbers = #tpu.dot_dimension_numbers<[1], [0], [0], [1], [0, 0, 1, 1], [], []>} : vector<8x512xbf16>, vector<512x128xbf16>, vector<8x128xf32> -> vector<8x128xf32>
    %c0_11 = arith.constant 0 : index
    %c0_12 = arith.constant 0 : index
    %17 = vector.load %arg5[%c0_11, %c0_12] : memref<1x128xf32, #tpu.memory_space<vmem>>, vector<1x128xf32>
    %18 = vector.broadcast %17 : vector<1x128xf32> to vector<8x128xf32>
    %19 = arith.addf %16, %18 : vector<8x128xf32>
    %c0_13 = arith.constant 0 : index
    %c0_14 = arith.constant 0 : index
    %20 = vector.load %arg6[%c0_13, %c0_14] : memref<8x128xf32, #tpu.memory_space<vmem>>, vector<8x128xf32>
    tpu.vector_store %arg6[%c0_13, %c0_14], %19 {strides = array<i32>} : memref<8x128xf32, #tpu.memory_space<vmem>>, vector<8x128xf32>,
    return
  }
  func.func @transform_0(%arg0: i32) -> (i32, i32) {
    %c0_i32 = arith.constant 0 : i32
    %c0_i32_0 = arith.constant 0 : i32
    return %arg0, %c0_i32 : i32, i32
  }
  func.func @transform_1(%arg0: i32) -> (i32, i32) {
    %c0_i32 = arith.constant 0 : i32
    %c0_i32_0 = arith.constant 0 : i32
    %c0_i32_1 = arith.constant 0 : i32
    return %c0_i32, %c0_i32_0 : i32, i32
  }
  func.func @transform_2(%arg0: i32) -> (i32, i32) {
    %c0_i32 = arith.constant 0 : i32
    %c0_i32_0 = arith.constant 0 : i32
    %c0_i32_1 = arith.constant 0 : i32
    return %c0_i32, %c0_i32_0 : i32, i32
  }
  func.func @transform_3(%arg0: i32) -> (i32, i32) {
    %c0_i32 = arith.constant 0 : i32
    %c0_i32_0 = arith.constant 0 : i32
    %c0_i32_1 = arith.constant 0 : i32
    return %c0_i32, %c0_i32_0 : i32, i32
  }
  func.func @transform_4(%arg0: i32) -> (i32, i32) {
    %c0_i32 = arith.constant 0 : i32
    %c0_i32_0 = arith.constant 0 : i32
    %c0_i32_1 = arith.constant 0 : i32
    return %c0_i32, %c0_i32_0 : i32, i32
  }
  func.func @transform_5(%arg0: i32) -> (i32, i32) {
    %c0_i32 = arith.constant 0 : i32
    %c0_i32_0 = arith.constant 0 : i32
    return %arg0, %c0_i32 : i32, i32
  }
}

</mosaic_0001>

<bundles_post_ra>
// kernel: neural_network_forward.1
= control target key start
LH: loop header
LB: loop body
LE: loop exit
PB: predicated region body
PF: predicated region fallthrough
CT: control target
= control target key end

     0   :  { %10 = vsyncpa [#allocation3], 0  ;;  %s2613_s18 = smov [#allocation2]   ;;  %s2785_s0 = inlined_call_operand.vmem [shape: f32[8,784], index: 0, kind: input, shape index: {}]   ;;  %s2786_s1 = inlined_call_operand.hbm [shape: bf16[784,512], index: 1, kind: input, shape index: {}]   ;;  %s2787_s2 = inlined_call_operand.vmem [shape: f32[1,512], index: 2, kind: input, shape index: {}]   ;;  %s2788_s3 = inlined_call_operand.vmem [shape: bf16[512,128], index: 3, kind: input, shape index: {}]   ;;  %s2789_s4 = inlined_call_operand.vmem [shape: f32[1,128], index: 4, kind: input, shape index: {}]   ;;  %s2790_s5 = inlined_call_operand.vmem [shape: f32[8,128], index: 5, kind: output, shape index: {}]  }
   0x1   :  { %s18_s19 = sshll.u32 %s2613_s18, 4  ;;  %s2589_s22 = scalar_lea.hbm %s2786_s1, 25088  ;;  %s19_s19 = int_to_ptr.vmem [resolvable:$true] %s18_s19 }
   0x2   :  { %p2590_p0 = scmp.ne.s32.totalorder %s2786_s1, %s2589_s22  ;;  %p2593_p1 = scmp.lt.u32.totalorder %s2589_s22, %s2786_s1 }
   0x4   :  { %p2595_p2 = pnand %p2593_p1, %p2590_p0 }
   0x6   :  { %2598 = shalt.err (!%p2595_p2)
}
   0x7   :  { %s2599_s27 = scalar_lea.vmem %s19_s19, 25088  ;;  %p2604_p4 = scmp.lt.s32.totalorder %s19_s19, %s19_s19 }
   0x8   :  { %p2600_p3 = scmp.ne.s32.totalorder %s19_s19, %s2599_s27  ;;  %p2605_p5 = scmp.lt.s32.totalorder %s2599_s27, %s2599_s27 }
   0xa   :  { %p2606_p6 = por %p2605_p5, %p2604_p4 }
   0xc   :  { %p2607_p7 = pnand %p2606_p6, %p2600_p3 }
   0xe   :  { %2610 = shalt.err (!%p2607_p7)
}
   0xf   :  { %s2614_s28 = smov 256   ;;  %s2615_s29 = smov 16  }
  0x10   :  { %24 = dma.hbm_to_vmem [thread:$0]  %s2786_s1, 25088, %s19_s19, [#allocation3], %s2614_s28, %s2614_s28, %s2615_s29  }
  0x11   :  { %2611 = dma.done.wait [#allocation3], 25088  }
  0x12   :  { %2612 = vsyncadd [#allocation3], 4294942208  ;;  %v2255_v0 = vld [vmem:[#allocation2 + $0x4] ss:$16 sps:$4 sm:$0xff]   ;;  %v2257_v1 = vld [vmem:[#allocation2 + $0xc] ss:$16 sps:$4 sm:$0xff]  }
  0x13   :  { %1251 = vmatprep.subr.bf16.mxu0 %v2255_v0  ;;  %v2259_v2 = vld [vmem:[#allocation2] ss:$16 sps:$4 sm:$0xff]   ;;  %v2260_v3 = vld [vmem:[#allocation2 + $0x8] ss:$16 sps:$4 sm:$0xff]   ;;  %1415 = vmatprep.subr.bf16.mxu1 %v2257_v1  ;;  %v2261_v4 = vld [vmem:[#allocation2 + $0x24] ss:$16 sps:$4 sm:$0xff]  }
  0x14   :  { %1252 = vmatpush1.bf16.msra.mxu0 %v2259_v2  ;;  %1416 = vmatpush1.bf16.msra.mxu1 %v2260_v3  ;;  %v2263_v5 = vld [vmem:[#allocation2 + $0x2c] ss:$16 sps:$4 sm:$0xff]   ;;  %v2265_v6 = vld [vmem:[#allocation2 + $0x20] ss:$16 sps:$4 sm:$0xff]   ;;  %v2266_v7 = vld [vmem:[#allocation2 + $0x28] ss:$16 sps:$4 sm:$0xff]  }
  0x15   :  { %1253 = vmatprep.subr.bf16.mxu0 %v2261_v4  ;;  %1417 = vmatprep.subr.bf16.mxu1 %v2263_v5  ;;  %v2267_v8 = vld [vmem:[#allocation2 + $0x44] ss:$16 sps:$4 sm:$0xff]   ;;  %v2269_v9 = vld [vmem:[#allocation2 + $0x4c] ss:$16 sps:$4 sm:$0xff]   ;;  %v2271_v10 = vld [vmem:[#allocation2 + $0x40] ss:$16 sps:$4 sm:$0xff]  }
  0x16   :  { %v2272_v11 = vld [vmem:[#allocation2 + $0x48] ss:$16 sps:$4 sm:$0xff]   ;;  %v2273_v12 = vld [vmem:[#allocation2 + $0x64] ss:$16 sps:$4 sm:$0xff]   ;;  %v2275_v13 = vld [vmem:[#allocation2 + $0x6c] ss:$16 sps:$4 sm:$0xff]  }
  0x17   :  { %v2277_v14 = vld [vmem:[#allocation2 + $0x60] ss:$16 sps:$4 sm:$0xff]   ;;  %v2278_v15 = vld [vmem:[#allocation2 + $0x68] ss:$16 sps:$4 sm:$0xff]   ;;  %v2279_v16 = vld [vmem:[#allocation2 + $0x84] ss:$16 sps:$4 sm:$0xff]  }
  0x18   :  { %1254 = vmatpush1.bf16.msra.mxu0 %v2265_v6  ;;  %1418 = vmatpush1.bf16.msra.mxu1 %v2266_v7  ;;  %v2281_v17 = vld [vmem:[#allocation2 + $0x8c] ss:$16 sps:$4 sm:$0xff]   ;;  %v2283_v18 = vld [vmem:[#allocation2 + $0x80] ss:$16 sps:$4 sm:$0xff]   ;;  %v2284_v19 = vld [vmem:[#allocation2 + $0x88] ss:$16 sps:$4 sm:$0xff]  }
  0x19   :  { %1255 = vmatprep.subr.bf16.mxu0 %v2267_v8  ;;  %1419 = vmatprep.subr.bf16.mxu1 %v2269_v9  ;;  %v2285_v20 = vld [vmem:[#allocation2 + $0xa4] ss:$16 sps:$4 sm:$0xff]   ;;  %v2287_v21 = vld [vmem:[#allocation2 + $0xac] ss:$16 sps:$4 sm:$0xff]   ;;  %v2289_v22 = vld [vmem:[#allocation2 + $0xa0] ss:$16 sps:$4 sm:$0xff]  }
  0x1a   :  { %v2290_v23 = vld [vmem:[#allocation2 + $0xa8] ss:$16 sps:$4 sm:$0xff]   ;;  %v2291_v24 = vld [vmem:[#allocation2 + $0xc4] ss:$16 sps:$4 sm:$0xff]   ;;  %v2293_v25 = vld [vmem:[#allocation2 + $0xcc] ss:$16 sps:$4 sm:$0xff]  }
  0x1b   :  { %v2295_v26 = vld [vmem:[#allocation2 + $0xc0] ss:$16 sps:$4 sm:$0xff]   ;;  %v2296_v27 = vld [vmem:[#allocation2 + $0xc8] ss:$16 sps:$4 sm:$0xff]   ;;  %v2297_v28 = vld [vmem:[#allocation2 + $0xe4] ss:$16 sps:$4 sm:$0xff]  }
  0x1c   :  { %1256 = vmatpush1.bf16.msra.mxu0 %v2271_v10  ;;  %1420 = vmatpush1.bf16.msra.mxu1 %v2272_v11  ;;  %v2299_v29 = vld [vmem:[#allocation2 + $0xec] ss:$16 sps:$4 sm:$0xff]   ;;  %v2301_v30 = vld [vmem:[#allocation2 + $0xe0] ss:$16 sps:$4 sm:$0xff]   ;;  %v2302_v31 = vld [vmem:[#allocation2 + $0xe8] ss:$16 sps:$4 sm:$0xff]  }
  0x1d   :  { %1257 = vmatprep.subr.bf16.mxu0 %v2273_v12  ;;  %1421 = vmatprep.subr.bf16.mxu1 %v2275_v13  ;;  %v2303_v32 = vld [vmem:[#allocation2 + $0x104] ss:$16 sps:$4 sm:$0xff]   ;;  %v2305_v33 = vld [vmem:[#allocation2 + $0x10c] ss:$16 sps:$4 sm:$0xff]   ;;  %v2307_v34 = vld [vmem:[#allocation2 + $0x100] ss:$16 sps:$4 sm:$0xff]  }
  0x1e   :  { %v2308_v35 = vld [vmem:[#allocation2 + $0x108] ss:$16 sps:$4 sm:$0xff]   ;;  %v2309_v36 = vld [vmem:[#allocation2 + $0x124] ss:$16 sps:$4 sm:$0xff]   ;;  %v2311_v37 = vld [vmem:[#allocation2 + $0x12c] ss:$16 sps:$4 sm:$0xff]  }
  0x1f   :  { %v2313_v38 = vld [vmem:[#allocation2 + $0x120] ss:$16 sps:$4 sm:$0xff]   ;;  %v2314_v39 = vld [vmem:[#allocation2 + $0x128] ss:$16 sps:$4 sm:$0xff]   ;;  %v2315_v40 = vld [vmem:[#allocation2 + $0x144] ss:$16 sps:$4 sm:$0xff]  }
  0x20   :  { %1258 = vmatpush1.bf16.msra.mxu0 %v2277_v14  ;;  %1422 = vmatpush1.bf16.msra.mxu1 %v2278_v15  ;;  %v2317_v41 = vld [vmem:[#allocation2 + $0x14c] ss:$16 sps:$4 sm:$0xff]   ;;  %v2319_v42 = vld [vmem:[#allocation2 + $0x140] ss:$16 sps:$4 sm:$0xff]   ;;  %v2320_v43 = vld [vmem:[#allocation2 + $0x148] ss:$16 sps:$4 sm:$0xff]  }
  0x21   :  { %1259 = vmatprep.subr.bf16.mxu0 %v2279_v16  ;;  %1423 = vmatprep.subr.bf16.mxu1 %v2281_v17  ;;  %v2321_v44 = vld [vmem:[#allocation2 + $0x164] ss:$16 sps:$4 sm:$0xff]   ;;  %v2323_v45 = vld [vmem:[#allocation2 + $0x16c] ss:$16 sps:$4 sm:$0xff]   ;;  %v2325_v47 = vld [vmem:[#allocation2 + $0x160] ss:$16 sps:$4 sm:$0xff]  }
  0x22   :  { %v36_v46 = vld [vmem:[%s2785_s0 + $0x8] sm:$0xff]  ;;  %v2327_v50 = vld [vmem:[#allocation2 + $0x184] ss:$16 sps:$4 sm:$0xff]   ;;  %v2331_v52 = vld [vmem:[#allocation2 + $0x180] ss:$16 sps:$4 sm:$0xff]   ;;  %vm1247_vm0 = vcmask 130048  }
  0x23   :  { %v43_v48 = vpack.c.bf16 %v36_v46, %v36_v46  ;;  %v2326_v49 = vld [vmem:[#allocation2 + $0x168] ss:$16 sps:$4 sm:$0xff]   ;;  %v2329_v51 = vld [vmem:[#allocation2 + $0x18c] ss:$16 sps:$4 sm:$0xff]   ;;  %v2333_v54 = vld [vmem:[#allocation2 + $0x1a4] ss:$16 sps:$4 sm:$0xff]  }
  0x24   :  { %1260 = vmatpush1.bf16.msra.mxu0 %v2283_v18  ;;  %1424 = vmatpush1.bf16.msra.mxu1 %v2284_v19  ;;  %v2332_v53 = vld [vmem:[#allocation2 + $0x188] ss:$16 sps:$4 sm:$0xff]   ;;  %v2335_v55 = vld [vmem:[#allocation2 + $0x1ac] ss:$16 sps:$4 sm:$0xff]   ;;  %v2337_v56 = vld [vmem:[#allocation2 + $0x1a0] ss:$16 sps:$4 sm:$0xff]  }
  0x25   :  { %1261 = vmatprep.subr.bf16.mxu0 %v2285_v20  ;;  %1425 = vmatprep.subr.bf16.mxu1 %v2287_v21  ;;  %v2338_v57 = vld [vmem:[#allocation2 + $0x1a8] ss:$16 sps:$4 sm:$0xff]   ;;  %v2339_v58 = vld [vmem:[#allocation2 + $0x1c4] ss:$16 sps:$4 sm:$0xff]   ;;  %v2341_v59 = vld [vmem:[#allocation2 + $0x1cc] ss:$16 sps:$4 sm:$0xff]  }
  0x26   :  { %1283 = vmatprep.mubr.bf16.mxu0 %v43_v48  ;;  %1447 = vmatprep.mubr.bf16.mxu1 %v43_v48  ;;  %v2343_v60 = vld [vmem:[#allocation2 + $0x1c0] ss:$16 sps:$4 sm:$0xff]   ;;  %v2344_v61 = vld [vmem:[#allocation2 + $0x1c8] ss:$16 sps:$4 sm:$0xff]   ;;  %v2345_v62 = vld [vmem:[#allocation2 + $0x1e4] ss:$16 sps:$4 sm:$0xff]  }
  0x27   :  { %v2347_v63 = vld [vmem:[#allocation2 + $0x1ec] ss:$16 sps:$4 sm:$0xff]   ;;  %v2349_v0 = vld [vmem:[#allocation2 + $0x1e0] ss:$16 sps:$4 sm:$0xff]   ;;  %v2350_v1 = vld [vmem:[#allocation2 + $0x1e8] ss:$16 sps:$4 sm:$0xff]  }
  0x28   :  { %1262 = vmatpush1.bf16.msra.mxu0 %v2289_v22  ;;  %1426 = vmatpush1.bf16.msra.mxu1 %v2290_v23  ;;  %v35_v2 = vld [vmem:[%s2785_s0] sm:$0xff]  ;;  %v2356_v4 = vld [vmem:[#allocation2 + $0x20c] ss:$16 sps:$4 sm:$0xff]   ;;  %v2354_v7 = vld [vmem:[#allocation2 + $0x208] ss:$16 sps:$4 sm:$0xff]  }
  0x29   :  { %1263 = vmatprep.subr.bf16.mxu0 %v2291_v24  ;;  %1427 = vmatprep.subr.bf16.mxu1 %v2293_v25  ;;  %v2353_v3 = vld [vmem:[#allocation2 + $0x204] ss:$16 sps:$4 sm:$0xff]   ;;  %v42_v5 = vpack.c.bf16 %v35_v2, %v35_v2  ;;  %v2351_v6 = vld [vmem:[#allocation2 + $0x200] ss:$16 sps:$4 sm:$0xff]   ;;  %v2362_v9 = vld [vmem:[#allocation2 + $0x22c] ss:$16 sps:$4 sm:$0xff]  }
  0x2a   :  { %v2359_v8 = vld [vmem:[#allocation2 + $0x224] ss:$16 sps:$4 sm:$0xff]   ;;  %v2357_v10 = vld [vmem:[#allocation2 + $0x220] ss:$16 sps:$4 sm:$0xff]   ;;  %v2360_v11 = vld [vmem:[#allocation2 + $0x228] ss:$16 sps:$4 sm:$0xff]  }
  0x2b   :  { %v2365_v12 = vld [vmem:[#allocation2 + $0x244] ss:$16 sps:$4 sm:$0xff]   ;;  %v2368_v13 = vld [vmem:[#allocation2 + $0x24c] ss:$16 sps:$4 sm:$0xff]   ;;  %v2363_v14 = vld [vmem:[#allocation2 + $0x240] ss:$16 sps:$4 sm:$0xff]  }
  0x2c   :  { %1264 = vmatpush1.bf16.msra.mxu0 %v2295_v26  ;;  %1428 = vmatpush1.bf16.msra.mxu1 %v2296_v27  ;;  %v2366_v15 = vld [vmem:[#allocation2 + $0x248] ss:$16 sps:$4 sm:$0xff]   ;;  %v2371_v16 = vld [vmem:[#allocation2 + $0x264] ss:$16 sps:$4 sm:$0xff]   ;;  %v2374_v17 = vld [vmem:[#allocation2 + $0x26c] ss:$16 sps:$4 sm:$0xff]  }
  0x2d   :  { %1265 = vmatprep.subr.bf16.mxu0 %v2297_v28  ;;  %1429 = vmatprep.subr.bf16.mxu1 %v2299_v29  ;;  %v2369_v18 = vld [vmem:[#allocation2 + $0x260] ss:$16 sps:$4 sm:$0xff]   ;;  %v2372_v19 = vld [vmem:[#allocation2 + $0x268] ss:$16 sps:$4 sm:$0xff]   ;;  %v2377_v20 = vld [vmem:[#allocation2 + $0x284] ss:$16 sps:$4 sm:$0xff]  }
  0x2e   :  { %v2380_v21 = vld [vmem:[#allocation2 + $0x28c] ss:$16 sps:$4 sm:$0xff]   ;;  %v2375_v22 = vld [vmem:[#allocation2 + $0x280] ss:$16 sps:$4 sm:$0xff]   ;;  %v2378_v23 = vld [vmem:[#allocation2 + $0x288] ss:$16 sps:$4 sm:$0xff]  }
  0x2f   :  { %v2383_v24 = vld [vmem:[#allocation2 + $0x2a4] ss:$16 sps:$4 sm:$0xff]   ;;  %v2386_v25 = vld [vmem:[#allocation2 + $0x2ac] ss:$16 sps:$4 sm:$0xff]   ;;  %v2381_v26 = vld [vmem:[#allocation2 + $0x2a0] ss:$16 sps:$4 sm:$0xff]  }
  0x30   :  { %1266 = vmatpush1.bf16.msra.mxu0 %v2301_v30  ;;  %1430 = vmatpush1.bf16.msra.mxu1 %v2302_v31  ;;  %v2384_v27 = vld [vmem:[#allocation2 + $0x2a8] ss:$16 sps:$4 sm:$0xff]   ;;  %v2389_v28 = vld [vmem:[#allocation2 + $0x2c4] ss:$16 sps:$4 sm:$0xff]   ;;  %v2392_v29 = vld [vmem:[#allocation2 + $0x2cc] ss:$16 sps:$4 sm:$0xff]  }
  0x31   :  { %1267 = vmatprep.subr.bf16.mxu0 %v2303_v32  ;;  %1431 = vmatprep.subr.bf16.mxu1 %v2305_v33  ;;  %v38_v30 = vld [vmem:[%s2785_s0 + $0x18] sm:$0xff]  ;;  %v2387_v31 = vld [vmem:[#allocation2 + $0x2c0] ss:$16 sps:$4 sm:$0xff]   ;;  %v2413_v46 = vld [vmem:[#allocation2 + $0x344] ss:$16 sps:$4 sm:$0xff]  }
  0x32   :  { %v45_v32 = vpack.c.bf16 %v38_v30, %v38_v30  ;;  %v2390_v33 = vld [vmem:[#allocation2 + $0x2c8] ss:$16 sps:$4 sm:$0xff]   ;;  %v2411_v48 = vld [vmem:[#allocation2 + $0x340] ss:$16 sps:$4 sm:$0xff]   ;;  %v2443_v2 = vld [vmem:[#allocation2 + $0x3e4] ss:$16 sps:$4 sm:$0xff]  }
  0x33   :  { %v2479_v30 = vld [vmem:[#allocation2 + $0x4a4] ss:$16 sps:$4 sm:$0xff]  }
  0x34   :  { %1268 = vmatpush1.bf16.msra.mxu0 %v2307_v34  ;;  %1432 = vmatpush1.bf16.msra.mxu1 %v2308_v35  ;;  %v2395_v34 = vld [vmem:[#allocation2 + $0x2e4] ss:$16 sps:$4 sm:$0xff]   ;;  %v2398_v35 = vld [vmem:[#allocation2 + $0x2ec] ss:$16 sps:$4 sm:$0xff]  }
  0x35   :  { %1269 = vmatprep.subr.bf16.mxu0 %v2309_v36  ;;  %1433 = vmatprep.subr.bf16.mxu1 %v2311_v37  ;;  %v2393_v36 = vld [vmem:[#allocation2 + $0x2e0] ss:$16 sps:$4 sm:$0xff]   ;;  %v2396_v37 = vld [vmem:[#allocation2 + $0x2e8] ss:$16 sps:$4 sm:$0xff]  }
  0x38   :  { %1270 = vmatpush1.bf16.msra.mxu0 %v2313_v38  ;;  %1434 = vmatpush1.bf16.msra.mxu1 %v2314_v39  ;;  %v2401_v38 = vld [vmem:[#allocation2 + $0x304] ss:$16 sps:$4 sm:$0xff]   ;;  %v2404_v39 = vld [vmem:[#allocation2 + $0x30c] ss:$16 sps:$4 sm:$0xff]  }
  0x39   :  { %1271 = vmatprep.subr.bf16.mxu0 %v2315_v40  ;;  %1435 = vmatprep.subr.bf16.mxu1 %v2317_v41  ;;  %v2399_v40 = vld [vmem:[#allocation2 + $0x300] ss:$16 sps:$4 sm:$0xff]   ;;  %v2402_v41 = vld [vmem:[#allocation2 + $0x308] ss:$16 sps:$4 sm:$0xff]  }
  0x3c   :  { %1272 = vmatpush1.bf16.msra.mxu0 %v2319_v42  ;;  %1436 = vmatpush1.bf16.msra.mxu1 %v2320_v43  ;;  %v2407_v42 = vld [vmem:[#allocation2 + $0x324] ss:$16 sps:$4 sm:$0xff]   ;;  %v2410_v43 = vld [vmem:[#allocation2 + $0x32c] ss:$16 sps:$4 sm:$0xff]  }
  0x3d   :  { %1273 = vmatprep.subr.bf16.mxu0 %v2321_v44  ;;  %1437 = vmatprep.subr.bf16.mxu1 %v2323_v45  ;;  %v2405_v44 = vld [vmem:[#allocation2 + $0x320] ss:$16 sps:$4 sm:$0xff]   ;;  %v2408_v45 = vld [vmem:[#allocation2 + $0x328] ss:$16 sps:$4 sm:$0xff]  }
  0x40   :  { %1274 = vmatpush1.bf16.msra.mxu0 %v2325_v47  ;;  %1438 = vmatpush1.bf16.msra.mxu1 %v2326_v49  ;;  %v2416_v47 = vld [vmem:[#allocation2 + $0x34c] ss:$16 sps:$4 sm:$0xff]   ;;  %v2414_v49 = vld [vmem:[#allocation2 + $0x348] ss:$16 sps:$4 sm:$0xff]  }
  0x41   :  { %1275 = vmatprep.subr.bf16.mxu0 %v2327_v50  ;;  %1439 = vmatprep.subr.bf16.mxu1 %v2329_v51  ;;  %v2419_v50 = vld [vmem:[#allocation2 + $0x364] ss:$16 sps:$4 sm:$0xff]   ;;  %v2422_v51 = vld [vmem:[#allocation2 + $0x36c] ss:$16 sps:$4 sm:$0xff]  }
  0x44   :  { %1276 = vmatpush1.bf16.msra.mxu0 %v2331_v52  ;;  %1440 = vmatpush1.bf16.msra.mxu1 %v2332_v53  ;;  %v2417_v52 = vld [vmem:[#allocation2 + $0x360] ss:$16 sps:$4 sm:$0xff]   ;;  %v2420_v53 = vld [vmem:[#allocation2 + $0x368] ss:$16 sps:$4 sm:$0xff]  }
  0x45   :  { %1277 = vmatprep.subr.bf16.mxu0 %v2333_v54  ;;  %1441 = vmatprep.subr.bf16.mxu1 %v2335_v55  ;;  %v2425_v54 = vld [vmem:[#allocation2 + $0x384] ss:$16 sps:$4 sm:$0xff]   ;;  %v2428_v55 = vld [vmem:[#allocation2 + $0x38c] ss:$16 sps:$4 sm:$0xff]  }
  0x48   :  { %1278 = vmatpush1.bf16.msra.mxu0 %v2337_v56  ;;  %1442 = vmatpush1.bf16.msra.mxu1 %v2338_v57  ;;  %v2423_v56 = vld [vmem:[#allocation2 + $0x380] ss:$16 sps:$4 sm:$0xff]   ;;  %v2426_v57 = vld [vmem:[#allocation2 + $0x388] ss:$16 sps:$4 sm:$0xff]  }
  0x49   :  { %1279 = vmatprep.subr.bf16.mxu0 %v2339_v58  ;;  %1443 = vmatprep.subr.bf16.mxu1 %v2341_v59  ;;  %v2431_v58 = vld [vmem:[#allocation2 + $0x3a4] ss:$16 sps:$4 sm:$0xff]   ;;  %v2434_v59 = vld [vmem:[#allocation2 + $0x3ac] ss:$16 sps:$4 sm:$0xff]  }
  0x4c   :  { %1280 = vmatpush1.bf16.msra.mxu0 %v2343_v60  ;;  %1444 = vmatpush1.bf16.msra.mxu1 %v2344_v61  ;;  %v2429_v60 = vld [vmem:[#allocation2 + $0x3a0] ss:$16 sps:$4 sm:$0xff]   ;;  %v2432_v61 = vld [vmem:[#allocation2 + $0x3a8] ss:$16 sps:$4 sm:$0xff]  }
  0x4d   :  { %1281 = vmatprep.subr.bf16.mxu0 %v2345_v62  ;;  %1445 = vmatprep.subr.bf16.mxu1 %v2347_v63  ;;  %v2437_v62 = vld [vmem:[#allocation2 + $0x3c4] ss:$16 sps:$4 sm:$0xff]   ;;  %v2440_v63 = vld [vmem:[#allocation2 + $0x3cc] ss:$16 sps:$4 sm:$0xff]  }
  0x50   :  { %1282 = vmatpush1.bf16.msra.mxu0 %v2349_v0  ;;  %1446 = vmatpush1.bf16.msra.mxu1 %v2350_v1  ;;  %v2435_v0 = vld [vmem:[#allocation2 + $0x3c0] ss:$16 sps:$4 sm:$0xff]   ;;  %v2438_v1 = vld [vmem:[#allocation2 + $0x3c8] ss:$16 sps:$4 sm:$0xff]  }
  0x51   :  { %1292 = vmatprep.subr.bf16.mxu0 %v2353_v3  ;;  %1456 = vmatprep.subr.bf16.mxu1 %v2356_v4  ;;  %v2446_v3 = vld [vmem:[#allocation2 + $0x3ec] ss:$16 sps:$4 sm:$0xff]   ;;  %v2441_v4 = vld [vmem:[#allocation2 + $0x3e0] ss:$16 sps:$4 sm:$0xff]  }
  0x53   :  { %1284 = vmatmul.mubr.bf16.vlgmr.msra.gmra.mrb[0].mxu0 %v42_v5  ;;  %1448 = vmatmul.mubr.bf16.vlgmr.msra.gmra.mrb[0].mxu1 %v42_v5  ;;  %v2444_v5 = vld [vmem:[#allocation2 + $0x3e8] ss:$16 sps:$4 sm:$0xff]  }
  0x54   :  { %1293 = vmatpush1.bf16.msra.mxu0 %v2351_v6  ;;  %1457 = vmatpush1.bf16.msra.mxu1 %v2354_v7  ;;  %v2449_v6 = vld [vmem:[#allocation2 + $0x404] ss:$16 sps:$4 sm:$0xff]  }
  0x55   :  { %1294 = vmatprep.subr.bf16.mxu0 %v2359_v8  ;;  %1458 = vmatprep.subr.bf16.mxu1 %v2362_v9  ;;  %v37_v7 = vld [vmem:[%s2785_s0 + $0x10] sm:$0xff]  ;;  %v2452_v8 = vld [vmem:[#allocation2 + $0x40c] ss:$16 sps:$4 sm:$0xff]  }
  0x56   :  { %1324 = vmatprep.mubr.bf16.mxu0 %v45_v32  ;;  %1488 = vmatprep.mubr.bf16.mxu1 %v45_v32  ;;  %v2447_v9 = vld [vmem:[#allocation2 + $0x400] ss:$16 sps:$4 sm:$0xff]  }
  0x57   :  { %v2477_v32 = vld [vmem:[#allocation2 + $0x4a0] ss:$16 sps:$4 sm:$0xff]  }
  0x58   :  { %1295 = vmatpush1.bf16.msra.mxu0 %v2357_v10  ;;  %1459 = vmatpush1.bf16.msra.mxu1 %v2360_v11  ;;  %v44_v10 = vpack.c.bf16 %v37_v7, %v37_v7  ;;  %v2450_v11 = vld [vmem:[#allocation2 + $0x408] ss:$16 sps:$4 sm:$0xff]   ;;  %v2542_v7 = vld [vmem:[#allocation2 + $0x5ec] ss:$16 sps:$4 sm:$0xff]  }
  0x59   :  { %1296 = vmatprep.subr.bf16.mxu0 %v2365_v12  ;;  %1460 = vmatprep.subr.bf16.mxu1 %v2368_v13  ;;  %v2455_v12 = vld [vmem:[#allocation2 + $0x424] ss:$16 sps:$4 sm:$0xff]   ;;  %v2458_v13 = vld [vmem:[#allocation2 + $0x42c] ss:$16 sps:$4 sm:$0xff]  }
  0x5c   :  { %1297 = vmatpush1.bf16.msra.mxu0 %v2363_v14  ;;  %1461 = vmatpush1.bf16.msra.mxu1 %v2366_v15  ;;  %v40_v14 = vld [vmem:[%s2785_s0 + $0x28] sm:$0xff] }
  0x5d   :  { %1298 = vmatprep.subr.bf16.mxu0 %v2371_v16  ;;  %1462 = vmatprep.subr.bf16.mxu1 %v2374_v17  ;;  %v47_v15 = vpack.c.bf16 %v40_v14, %v40_v14  ;;  %v2453_v16 = vld [vmem:[#allocation2 + $0x420] ss:$16 sps:$4 sm:$0xff]   ;;  %v2456_v17 = vld [vmem:[#allocation2 + $0x428] ss:$16 sps:$4 sm:$0xff]  }
  0x5e   :  { %v2543_v14 = vld [vmem:[#allocation2 + $0x600] ss:$16 sps:$4 sm:$0xff]  }
  0x60   :  { %1299 = vmatpush1.bf16.msra.mxu0 %v2369_v18  ;;  %1463 = vmatpush1.bf16.msra.mxu1 %v2372_v19  ;;  %v2461_v18 = vld [vmem:[#allocation2 + $0x444] ss:$16 sps:$4 sm:$0xff]   ;;  %v2464_v19 = vld [vmem:[#allocation2 + $0x44c] ss:$16 sps:$4 sm:$0xff]  }
  0x61   :  { %1300 = vmatprep.subr.bf16.mxu0 %v2377_v20  ;;  %1464 = vmatprep.subr.bf16.mxu1 %v2380_v21  ;;  %v2459_v20 = vld [vmem:[#allocation2 + $0x440] ss:$16 sps:$4 sm:$0xff]   ;;  %v2462_v21 = vld [vmem:[#allocation2 + $0x448] ss:$16 sps:$4 sm:$0xff]  }
  0x64   :  { %1301 = vmatpush1.bf16.msra.mxu0 %v2375_v22  ;;  %1465 = vmatpush1.bf16.msra.mxu1 %v2378_v23  ;;  %v2467_v22 = vld [vmem:[#allocation2 + $0x464] ss:$16 sps:$4 sm:$0xff]   ;;  %v2470_v23 = vld [vmem:[#allocation2 + $0x46c] ss:$16 sps:$4 sm:$0xff]  }
  0x65   :  { %1302 = vmatprep.subr.bf16.mxu0 %v2383_v24  ;;  %1466 = vmatprep.subr.bf16.mxu1 %v2386_v25  ;;  %v2465_v24 = vld [vmem:[#allocation2 + $0x460] ss:$16 sps:$4 sm:$0xff]   ;;  %v2468_v25 = vld [vmem:[#allocation2 + $0x468] ss:$16 sps:$4 sm:$0xff]  }
  0x68   :  { %1303 = vmatpush1.bf16.msra.mxu0 %v2381_v26  ;;  %1467 = vmatpush1.bf16.msra.mxu1 %v2384_v27  ;;  %v2473_v26 = vld [vmem:[#allocation2 + $0x484] ss:$16 sps:$4 sm:$0xff]   ;;  %v2476_v27 = vld [vmem:[#allocation2 + $0x48c] ss:$16 sps:$4 sm:$0xff]  }
  0x69   :  { %1304 = vmatprep.subr.bf16.mxu0 %v2389_v28  ;;  %1468 = vmatprep.subr.bf16.mxu1 %v2392_v29  ;;  %v2471_v28 = vld [vmem:[#allocation2 + $0x480] ss:$16 sps:$4 sm:$0xff]   ;;  %v2474_v29 = vld [vmem:[#allocation2 + $0x488] ss:$16 sps:$4 sm:$0xff]  }
  0x6c   :  { %1305 = vmatpush1.bf16.msra.mxu0 %v2387_v31  ;;  %1469 = vmatpush1.bf16.msra.mxu1 %v2390_v33  ;;  %v2482_v31 = vld [vmem:[#allocation2 + $0x4ac] ss:$16 sps:$4 sm:$0xff]   ;;  %v2480_v33 = vld [vmem:[#allocation2 + $0x4a8] ss:$16 sps:$4 sm:$0xff]  }
  0x6d   :  { %1306 = vmatprep.subr.bf16.mxu0 %v2395_v34  ;;  %1470 = vmatprep.subr.bf16.mxu1 %v2398_v35  ;;  %v2485_v34 = vld [vmem:[#allocation2 + $0x4c4] ss:$16 sps:$4 sm:$0xff]   ;;  %v2488_v35 = vld [vmem:[#allocation2 + $0x4cc] ss:$16 sps:$4 sm:$0xff]  }
  0x70   :  { %1307 = vmatpush1.bf16.msra.mxu0 %v2393_v36  ;;  %1471 = vmatpush1.bf16.msra.mxu1 %v2396_v37  ;;  %v2483_v36 = vld [vmem:[#allocation2 + $0x4c0] ss:$16 sps:$4 sm:$0xff]   ;;  %v2486_v37 = vld [vmem:[#allocation2 + $0x4c8] ss:$16 sps:$4 sm:$0xff]  }
  0x71   :  { %1308 = vmatprep.subr.bf16.mxu0 %v2401_v38  ;;  %1472 = vmatprep.subr.bf16.mxu1 %v2404_v39  ;;  %v2491_v38 = vld [vmem:[#allocation2 + $0x4e4] ss:$16 sps:$4 sm:$0xff]   ;;  %v2494_v39 = vld [vmem:[#allocation2 + $0x4ec] ss:$16 sps:$4 sm:$0xff]  }
  0x74   :  { %1309 = vmatpush1.bf16.msra.mxu0 %v2399_v40  ;;  %1473 = vmatpush1.bf16.msra.mxu1 %v2402_v41  ;;  %v2489_v40 = vld [vmem:[#allocation2 + $0x4e0] ss:$16 sps:$4 sm:$0xff]   ;;  %v2492_v41 = vld [vmem:[#allocation2 + $0x4e8] ss:$16 sps:$4 sm:$0xff]  }
  0x75   :  { %1310 = vmatprep.subr.bf16.mxu0 %v2407_v42  ;;  %1474 = vmatprep.subr.bf16.mxu1 %v2410_v43  ;;  %v2497_v42 = vld [vmem:[#allocation2 + $0x504] ss:$16 sps:$4 sm:$0xff]   ;;  %v2500_v43 = vld [vmem:[#allocation2 + $0x50c] ss:$16 sps:$4 sm:$0xff]  }
  0x78   :  { %1311 = vmatpush1.bf16.msra.mxu0 %v2405_v44  ;;  %1475 = vmatpush1.bf16.msra.mxu1 %v2408_v45  ;;  %v2495_v44 = vld [vmem:[#allocation2 + $0x500] ss:$16 sps:$4 sm:$0xff]   ;;  %v2498_v45 = vld [vmem:[#allocation2 + $0x508] ss:$16 sps:$4 sm:$0xff]  }
  0x79   :  { %1312 = vmatprep.subr.bf16.mxu0 %v2413_v46  ;;  %1476 = vmatprep.subr.bf16.mxu1 %v2416_v47  ;;  %v2503_v46 = vld [vmem:[#allocation2 + $0x524] ss:$16 sps:$4 sm:$0xff]   ;;  %v2506_v47 = vld [vmem:[#allocation2 + $0x52c] ss:$16 sps:$4 sm:$0xff]  }
  0x7c   :  { %1313 = vmatpush1.bf16.msra.mxu0 %v2411_v48  ;;  %1477 = vmatpush1.bf16.msra.mxu1 %v2414_v49  ;;  %v2501_v48 = vld [vmem:[#allocation2 + $0x520] ss:$16 sps:$4 sm:$0xff]   ;;  %v2504_v49 = vld [vmem:[#allocation2 + $0x528] ss:$16 sps:$4 sm:$0xff]  }
  0x7d   :  { %1314 = vmatprep.subr.bf16.mxu0 %v2419_v50  ;;  %1478 = vmatprep.subr.bf16.mxu1 %v2422_v51  ;;  %v2509_v50 = vld [vmem:[#allocation2 + $0x544] ss:$16 sps:$4 sm:$0xff]   ;;  %v2512_v51 = vld [vmem:[#allocation2 + $0x54c] ss:$16 sps:$4 sm:$0xff]  }
  0x80   :  { %1315 = vmatpush1.bf16.msra.mxu0 %v2417_v52  ;;  %1479 = vmatpush1.bf16.msra.mxu1 %v2420_v53  ;;  %v2507_v52 = vld [vmem:[#allocation2 + $0x540] ss:$16 sps:$4 sm:$0xff]   ;;  %v2510_v53 = vld [vmem:[#allocation2 + $0x548] ss:$16 sps:$4 sm:$0xff]  }
  0x81   :  { %1316 = vmatprep.subr.bf16.mxu0 %v2425_v54  ;;  %1480 = vmatprep.subr.bf16.mxu1 %v2428_v55  ;;  %v2515_v54 = vld [vmem:[#allocation2 + $0x564] ss:$16 sps:$4 sm:$0xff]   ;;  %v2518_v55 = vld [vmem:[#allocation2 + $0x56c] ss:$16 sps:$4 sm:$0xff]  }
  0x84   :  { %1317 = vmatpush1.bf16.msra.mxu0 %v2423_v56  ;;  %1481 = vmatpush1.bf16.msra.mxu1 %v2426_v57  ;;  %v2513_v56 = vld [vmem:[#allocation2 + $0x560] ss:$16 sps:$4 sm:$0xff]   ;;  %v2516_v57 = vld [vmem:[#allocation2 + $0x568] ss:$16 sps:$4 sm:$0xff]  }
  0x85   :  { %1318 = vmatprep.subr.bf16.mxu0 %v2431_v58  ;;  %1482 = vmatprep.subr.bf16.mxu1 %v2434_v59  ;;  %v2521_v58 = vld [vmem:[#allocation2 + $0x584] ss:$16 sps:$4 sm:$0xff]   ;;  %v2524_v59 = vld [vmem:[#allocation2 + $0x58c] ss:$16 sps:$4 sm:$0xff]  }
  0x88   :  { %1319 = vmatpush1.bf16.msra.mxu0 %v2429_v60  ;;  %1483 = vmatpush1.bf16.msra.mxu1 %v2432_v61  ;;  %v2519_v60 = vld [vmem:[#allocation2 + $0x580] ss:$16 sps:$4 sm:$0xff]   ;;  %v2522_v61 = vld [vmem:[#allocation2 + $0x588] ss:$16 sps:$4 sm:$0xff]  }
  0x89   :  { %1320 = vmatprep.subr.bf16.mxu0 %v2437_v62  ;;  %1484 = vmatprep.subr.bf16.mxu1 %v2440_v63  ;;  %v2527_v62 = vld [vmem:[#allocation2 + $0x5a4] ss:$16 sps:$4 sm:$0xff]   ;;  %v2530_v63 = vld [vmem:[#allocation2 + $0x5ac] ss:$16 sps:$4 sm:$0xff]  }
  0x8c   :  { %1321 = vmatpush1.bf16.msra.mxu0 %v2435_v0  ;;  %1485 = vmatpush1.bf16.msra.mxu1 %v2438_v1  ;;  %v2525_v0 = vld [vmem:[#allocation2 + $0x5a0] ss:$16 sps:$4 sm:$0xff]   ;;  %v2528_v1 = vld [vmem:[#allocation2 + $0x5a8] ss:$16 sps:$4 sm:$0xff]  }
  0x8d   :  { %1322 = vmatprep.subr.bf16.mxu0 %v2443_v2  ;;  %1486 = vmatprep.subr.bf16.mxu1 %v2446_v3  ;;  %v2533_v2 = vld [vmem:[#allocation2 + $0x5c4] ss:$16 sps:$4 sm:$0xff]   ;;  %v2536_v3 = vld [vmem:[#allocation2 + $0x5cc] ss:$16 sps:$4 sm:$0xff]  }
  0x90   :  { %1323 = vmatpush1.bf16.msra.mxu0 %v2441_v4  ;;  %1487 = vmatpush1.bf16.msra.mxu1 %v2444_v5  ;;  %v2531_v4 = vld [vmem:[#allocation2 + $0x5c0] ss:$16 sps:$4 sm:$0xff]   ;;  %v2534_v5 = vld [vmem:[#allocation2 + $0x5c8] ss:$16 sps:$4 sm:$0xff]  }
  0x91   :  { %1333 = vmatprep.subr.bf16.mxu0 %v2449_v6  ;;  %1497 = vmatprep.subr.bf16.mxu1 %v2452_v8  ;;  %v2539_v6 = vld [vmem:[#allocation2 + $0x5e4] ss:$16 sps:$4 sm:$0xff]   ;;  %v2537_v8 = vld [vmem:[#allocation2 + $0x5e0] ss:$16 sps:$4 sm:$0xff]  }
  0x93   :  { %1325 = vmatmul.mubr.bf16.vlgmr.msra.gmra.mrb[0].mxu0 %v44_v10  ;;  %1489 = vmatmul.mubr.bf16.vlgmr.msra.gmra.mrb[0].mxu1 %v44_v10  ;;  %v39_v10 = vld [vmem:[%s2785_s0 + $0x20] sm:$0xff] }
  0x94   :  { %1334 = vmatpush1.bf16.msra.mxu0 %v2447_v9  ;;  %1498 = vmatpush1.bf16.msra.mxu1 %v2450_v11  ;;  %v2540_v9 = vld [vmem:[#allocation2 + $0x5e8] ss:$16 sps:$4 sm:$0xff]   ;;  %v2545_v11 = vld [vmem:[#allocation2 + $0x604] ss:$16 sps:$4 sm:$0xff]  }
  0x95   :  { %1335 = vmatprep.subr.bf16.mxu0 %v2455_v12  ;;  %1499 = vmatprep.subr.bf16.mxu1 %v2458_v13  ;;  %v2548_v12 = vld [vmem:[#allocation2 + $0x60c] ss:$16 sps:$4 sm:$0xff]   ;;  %v46_v13 = vpack.c.bf16 %v39_v10, %v39_v10 }
  0x96   :  { %1365 = vmatprep.mubr.bf16.mxu0 %v47_v15  ;;  %1529 = vmatprep.mubr.bf16.mxu1 %v47_v15  ;;  %v2546_v15 = vld [vmem:[#allocation2 + $0x608] ss:$16 sps:$4 sm:$0xff]  }
  0x98   :  { %1336 = vmatpush1.bf16.msra.mxu0 %v2453_v16  ;;  %1500 = vmatpush1.bf16.msra.mxu1 %v2456_v17  ;;  %v2549_v16 = vld [vmem:[%s2788_s3 + $0x40] sm:$0xff]  }
  0x99   :  { %1337 = vmatprep.subr.bf16.mxu0 %v2461_v18  ;;  %1501 = vmatprep.subr.bf16.mxu1 %v2464_v19  ;;  %v2550_v17 = vld [vmem:[%s2788_s3 + $0xc0] sm:$0xff]   ;;  %v2616_v18 = vmov 0   ;;  %v41_v19 = vld [vmem:[%s2785_s0 + $0x30] sm:$0xff] }
  0x9c   :  { %1338 = vmatpush1.bf16.msra.mxu0 %v2459_v20  ;;  %1502 = vmatpush1.bf16.msra.mxu1 %v2462_v21  ;;  %v48_v20 = vpack.c.bf16 %v41_v19, %v41_v19  ;;  %v2551_v21 = vld [vmem:[%s2788_s3] sm:$0xff]  }
  0x9d   :  { %1339 = vmatprep.subr.bf16.mxu0 %v2467_v22  ;;  %1503 = vmatprep.subr.bf16.mxu1 %v2470_v23  ;;  %v2552_v22 = vld [vmem:[%s2788_s3 + $0x80] sm:$0xff]   ;;  %v2553_v23 = vld [vmem:[%s2788_s3 + $0x48] sm:$0xff]  }
  0xa0   :  { %1340 = vmatpush1.bf16.msra.mxu0 %v2465_v24  ;;  %1504 = vmatpush1.bf16.msra.mxu1 %v2468_v25  ;;  %v2554_v24 = vld [vmem:[%s2788_s3 + $0xc8] sm:$0xff]  }
  0xa1   :  { %1341 = vmatprep.subr.bf16.mxu0 %v2473_v26  ;;  %1505 = vmatprep.subr.bf16.mxu1 %v2476_v27  ;;  %v2555_v25 = vld [vmem:[%s2788_s3 + $0x8] sm:$0xff]   ;;  %v2557_v27 = vld [vmem:[%s2788_s3 + $0x50] sm:$0xff]  }
  0xa2   :  { %v2556_v26 = vld [vmem:[%s2788_s3 + $0x88] sm:$0xff]  }
  0xa4   :  { %1342 = vmatpush1.bf16.msra.mxu0 %v2471_v28  ;;  %1506 = vmatpush1.bf16.msra.mxu1 %v2474_v29  ;;  %v2558_v28 = vld [vmem:[%s2788_s3 + $0xd0] sm:$0xff]  }
  0xa5   :  { %1343 = vmatprep.subr.bf16.mxu0 %v2479_v30  ;;  %1507 = vmatprep.subr.bf16.mxu1 %v2482_v31  ;;  %v2559_v29 = vld [vmem:[%s2788_s3 + $0x10] sm:$0xff]   ;;  %v2561_v31 = vld [vmem:[%s2788_s3 + $0x58] sm:$0xff]  }
  0xa6   :  { %v2560_v30 = vld [vmem:[%s2788_s3 + $0x90] sm:$0xff]  }
  0xa8   :  { %1344 = vmatpush1.bf16.msra.mxu0 %v2477_v32  ;;  %1508 = vmatpush1.bf16.msra.mxu1 %v2480_v33  ;;  %v2562_v32 = vld [vmem:[%s2788_s3 + $0xd8] sm:$0xff]  }
  0xa9   :  { %1345 = vmatprep.subr.bf16.mxu0 %v2485_v34  ;;  %1509 = vmatprep.subr.bf16.mxu1 %v2488_v35  ;;  %v2563_v33 = vld [vmem:[%s2788_s3 + $0x18] sm:$0xff]   ;;  %v2565_v35 = vld [vmem:[%s2788_s3 + $0x60] sm:$0xff]  }
  0xaa   :  { %v2564_v34 = vld [vmem:[%s2788_s3 + $0x98] sm:$0xff]  }
  0xac   :  { %1346 = vmatpush1.bf16.msra.mxu0 %v2483_v36  ;;  %1510 = vmatpush1.bf16.msra.mxu1 %v2486_v37  ;;  %v2566_v36 = vld [vmem:[%s2788_s3 + $0xe0] sm:$0xff]  }
  0xad   :  { %1347 = vmatprep.subr.bf16.mxu0 %v2491_v38  ;;  %1511 = vmatprep.subr.bf16.mxu1 %v2494_v39  ;;  %v2567_v37 = vld [vmem:[%s2788_s3 + $0x20] sm:$0xff]   ;;  %v2569_v39 = vld [vmem:[%s2788_s3 + $0x68] sm:$0xff]  }
  0xae   :  { %v2568_v38 = vld [vmem:[%s2788_s3 + $0xa0] sm:$0xff]  }
  0xb0   :  { %1348 = vmatpush1.bf16.msra.mxu0 %v2489_v40  ;;  %1512 = vmatpush1.bf16.msra.mxu1 %v2492_v41  ;;  %v2570_v40 = vld [vmem:[%s2788_s3 + $0xe8] sm:$0xff]  }
  0xb1   :  { %1349 = vmatprep.subr.bf16.mxu0 %v2497_v42  ;;  %1513 = vmatprep.subr.bf16.mxu1 %v2500_v43  ;;  %v2571_v41 = vld [vmem:[%s2788_s3 + $0x28] sm:$0xff]   ;;  %v2573_v43 = vld [vmem:[%s2788_s3 + $0x70] sm:$0xff]  }
  0xb2   :  { %v2572_v42 = vld [vmem:[%s2788_s3 + $0xa8] sm:$0xff]  }
  0xb4   :  { %1350 = vmatpush1.bf16.msra.mxu0 %v2495_v44  ;;  %1514 = vmatpush1.bf16.msra.mxu1 %v2498_v45  ;;  %v2574_v44 = vld [vmem:[%s2788_s3 + $0xf0] sm:$0xff]  }
  0xb5   :  { %1351 = vmatprep.subr.bf16.mxu0 %v2503_v46  ;;  %1515 = vmatprep.subr.bf16.mxu1 %v2506_v47  ;;  %v2575_v45 = vld [vmem:[%s2788_s3 + $0x30] sm:$0xff]   ;;  %v2577_v47 = vld [vmem:[%s2788_s3 + $0x78] sm:$0xff]  }
  0xb6   :  { %v2576_v46 = vld [vmem:[%s2788_s3 + $0xb0] sm:$0xff]  }
  0xb8   :  { %1352 = vmatpush1.bf16.msra.mxu0 %v2501_v48  ;;  %1516 = vmatpush1.bf16.msra.mxu1 %v2504_v49  ;;  %v2578_v48 = vld [vmem:[%s2788_s3 + $0xf8] sm:$0xff]  }
  0xb9   :  { %1353 = vmatprep.subr.bf16.mxu0 %v2509_v50  ;;  %1517 = vmatprep.subr.bf16.mxu1 %v2512_v51  ;;  %v2579_v49 = vld [vmem:[%s2788_s3 + $0x38] sm:$0xff]   ;;  %v247_v51 = vlaneseq }
  0xba   :  { %v2580_v50 = vld [vmem:[%s2788_s3 + $0xb8] sm:$0xff]  }
  0xbc   :  { %1354 = vmatpush1.bf16.msra.mxu0 %v2507_v52  ;;  %1518 = vmatpush1.bf16.msra.mxu1 %v2510_v53  ;;  %v248_v52 = vshrl.u32 %v247_v51, 7 }
  0xbd   :  { %1355 = vmatprep.subr.bf16.mxu0 %v2515_v54  ;;  %1519 = vmatprep.subr.bf16.mxu1 %v2518_v55  ;;  %v245_v55 = vld [vmem:[%s2787_s2] sm:$0xf] }
  0xbe   :  { %v249_v53 = vsub.s32 0, %v248_v52  ;;  %v257_v54 = vsub.s32 2, %v248_v52 }
  0xc0   :  { %1356 = vmatpush1.bf16.msra.mxu0 %v2513_v56  ;;  %1520 = vmatpush1.bf16.msra.mxu1 %v2516_v57  ;;  %v253_v56 = vsub.s32 1, %v248_v52  ;;  %v261_v57 = vsub.s32 3, %v248_v52 }
  0xc1   :  { %1357 = vmatprep.subr.bf16.mxu0 %v2521_v58  ;;  %1521 = vmatprep.subr.bf16.mxu1 %v2524_v59  ;;  %v250_v58 = vrot.slane %v245_v55, %v249_v53  ;;  %v258_v59 = vrot.slane %v245_v55, %v257_v54 }
  0xc4   :  { %1358 = vmatpush1.bf16.msra.mxu0 %v2519_v60  ;;  %1522 = vmatpush1.bf16.msra.mxu1 %v2522_v61  ;;  %v254_v60 = vrot.slane %v245_v55, %v253_v56  ;;  %v262_v61 = vrot.slane %v245_v55, %v261_v57 }
  0xc5   :  { %1359 = vmatprep.subr.bf16.mxu0 %v2527_v62  ;;  %1523 = vmatprep.subr.bf16.mxu1 %v2530_v63 }
  0xc8   :  { %1360 = vmatpush1.bf16.msra.mxu0 %v2525_v0  ;;  %1524 = vmatpush1.bf16.msra.mxu1 %v2528_v1 }
  0xc9   :  { %1361 = vmatprep.subr.bf16.mxu0 %v2533_v2  ;;  %1525 = vmatprep.subr.bf16.mxu1 %v2536_v3 }
  0xcc   :  { %1362 = vmatpush1.bf16.msra.mxu0 %v2531_v4  ;;  %1526 = vmatpush1.bf16.msra.mxu1 %v2534_v5 }
  0xcd   :  { %1363 = vmatprep.subr.bf16.mxu0 %v2539_v6  ;;  %1527 = vmatprep.subr.bf16.mxu1 %v2542_v7 }
  0xd0   :  { %1364 = vmatpush1.bf16.msra.mxu0 %v2537_v8  ;;  %1528 = vmatpush1.bf16.msra.mxu1 %v2540_v9 }
  0xd1   :  { %1374 = vmatprep.subr.bf16.mxu0 %v2545_v11  ;;  %1538 = vmatprep.subr.bf16.mxu1 %v2548_v12 }
  0xd3   :  { %1366 = vmatmul.mubr.bf16.vlgmr.msra.gmra.mrb[0].mxu0 %v46_v13  ;;  %1530 = vmatmul.mubr.bf16.vlgmr.msra.gmra.mrb[0].mxu1 %v46_v13 }
  0xd4   :  { %1375 = vmatpush1.bf16.msra.mxu0 %v2543_v14  ;;  %1539 = vmatpush1.bf16.msra.mxu1 %v2546_v15 }
  0xd5   :  { %1406 = vmatprep.mubr.bf16.mxu0 %v2616_v18  ;;  %1570 = vmatprep.mubr.bf16.mxu1 %v2616_v18 }
  0xd6   :  { %2179 = vmatprep.subr.bf16.mxu0 %v2549_v16  ;;  %2201 = vmatprep.subr.bf16.mxu1 %v2550_v17 }
  0xdf   :  { %2144 = vmatmul.mubr.msk.bf16.vlgmr.msra.gmra.mrb[0].mxu0 %vm1247_vm0, %v48_v20  ;;  %2145 = vmatmul.mubr.msk.bf16.vlgmr.msra.gmra.mrb[0].mxu1 %vm1247_vm0, %v48_v20 }
  0xe0   :  { %2180 = vmatpush3.bf16.msra.mxu0 %v2551_v21  ;;  %2202 = vmatpush3.bf16.msra.mxu1 %v2552_v22 }
  0xe1   :  { %2181 = vmatprep.subr.bf16.mxu0 %v2553_v23  ;;  %2203 = vmatprep.subr.bf16.mxu1 %v2554_v24 }
  0xe4   :  { %2182 = vmatpush3.bf16.msra.mxu0 %v2555_v25  ;;  %2204 = vmatpush3.bf16.msra.mxu1 %v2556_v26 }
  0xe5   :  { %2183 = vmatprep.subr.bf16.mxu0 %v2557_v27  ;;  %2205 = vmatprep.subr.bf16.mxu1 %v2558_v28 }
  0xe8   :  { %2184 = vmatpush3.bf16.msra.mxu0 %v2559_v29  ;;  %2206 = vmatpush3.bf16.msra.mxu1 %v2560_v30 }
  0xe9   :  { %2185 = vmatprep.subr.bf16.mxu0 %v2561_v31  ;;  %2207 = vmatprep.subr.bf16.mxu1 %v2562_v32  ;;  %v2146_v32 = vld [vmem:[%s2789_s4] ss:$0 sm:$0xff] }
  0xec   :  { %2186 = vmatpush3.bf16.msra.mxu0 %v2563_v33  ;;  %2208 = vmatpush3.bf16.msra.mxu1 %v2564_v34 }
  0xed   :  { %2187 = vmatprep.subr.bf16.mxu0 %v2565_v35  ;;  %2209 = vmatprep.subr.bf16.mxu1 %v2566_v36 }
  0xf0   :  { %2188 = vmatpush3.bf16.msra.mxu0 %v2567_v37  ;;  %2210 = vmatpush3.bf16.msra.mxu1 %v2568_v38 }
  0xf1   :  { %2189 = vmatprep.subr.bf16.mxu0 %v2569_v39  ;;  %2211 = vmatprep.subr.bf16.mxu1 %v2570_v40 }
  0xf4   :  { %2190 = vmatpush3.bf16.msra.mxu0 %v2571_v41  ;;  %2212 = vmatpush3.bf16.msra.mxu1 %v2572_v42 }
  0xf5   :  { %2191 = vmatprep.subr.bf16.mxu0 %v2573_v43  ;;  %2213 = vmatprep.subr.bf16.mxu1 %v2574_v44 }
  0xf8   :  { %2192 = vmatpush3.bf16.msra.mxu0 %v2575_v45  ;;  %2214 = vmatpush3.bf16.msra.mxu1 %v2576_v46 }
  0xf9   :  { %2193 = vmatprep.subr.bf16.mxu0 %v2577_v47  ;;  %2215 = vmatprep.subr.bf16.mxu1 %v2578_v48 }
  0xfc   :  { %2194 = vmatpush3.bf16.msra.mxu0 %v2579_v49  ;;  %2216 = vmatpush3.bf16.msra.mxu1 %v2580_v50 }
 0x1b2   :  { %v1408_v62 = vpop.f32.mrb[0].mxu0  ;;  %v1572_v63 = vpop.f32.mrb[0].mxu1 }
 0x1b3   :  { %v2223_v0 = vadd.f32 %v1408_v62, %v250_v58  ;;  %v2225_v1 = vadd.f32 %v1572_v63, %v258_v59  ;;  %v1410_v2 = vpop.f32.mrb[1].mxu0  ;;  %v1574_v3 = vpop.f32.mrb[1].mxu1 }
 0x1b4   :  { %v2224_v4 = vadd.f32 %v1410_v2, %v254_v60  ;;  %v2226_v5 = vadd.f32 %v1574_v3, %v262_v61  ;;  %v1412_v6 = vpop.f32.mrb[2].mxu0  ;;  %v1576_v7 = vpop.f32.mrb[2].mxu1 }
 0x1b5   :  { %v1579_v8 = vmul.f32 0.5, %v2223_v0  ;;  %v1581_v9 = vmul.f32 0.5, %v2225_v1  ;;  %v1413_v10 = vpop.f32.mrb[3].mxu0  ;;  %v1577_v11 = vpop.f32.mrb[3].mxu1 }
 0x1b6   :  { %v1580_v12 = vmul.f32 0.5, %v2224_v4  ;;  %v1582_v13 = vmul.f32 0.5, %v2226_v5 }
 0x1b7   :  { %2581 = vtanh.f32 %v1579_v8 }
 0x1b8   :  { %2583 = vtanh.f32 %v1581_v9 }
 0x1b9   :  { %2585 = vtanh.f32 %v1580_v12 }
 0x1ba   :  { %2587 = vtanh.f32 %v1582_v13 }
 0x1c1   :  { %v2582_v14 = vpop.eup %2581 }
 0x1c2   :  { %v2584_v15 = vpop.eup %2583  ;;  %v1587_v16 = vmul.f32 0.5, %v2582_v14 }
 0x1c3   :  { %v2586_v17 = vpop.eup %2585  ;;  %v1589_v18 = vmul.f32 0.5, %v2584_v15 }
 0x1c4   :  { %v2588_v19 = vpop.eup %2587  ;;  %v1588_v20 = vmul.f32 0.5, %v2586_v17  ;;  %v1591_v21 = vadd.f32 0.5, %v1587_v16 }
 0x1c5   :  { %v1590_v22 = vmul.f32 0.5, %v2588_v19  ;;  %v1593_v23 = vadd.f32 0.5, %v1589_v18 }
 0x1c6   :  { %v1592_v24 = vadd.f32 0.5, %v1588_v20  ;;  %v1595_v27 = vpack.c.bf16 %v1591_v21, %v1591_v21 }
 0x1c7   :  { %v1594_v25 = vadd.f32 0.5, %v1590_v22  ;;  %v1597_v29 = vpack.c.bf16 %v1593_v23, %v1593_v23 }
 0x1c8   :  { %v1596_v26 = vpack.c.bf16 %v1592_v24, %v1592_v24 }
 0x1c9   :  { %v1598_v28 = vpack.c.bf16 %v1594_v25, %v1594_v25 }
 0x1ca   :  { %1894 = vmatprep.mubr.bf16.mxu0 %v1596_v26 }
 0x1cb   :  { %1934 = vmatprep.mubr.bf16.mxu1 %v1598_v28  ;;  %1895 = vmatmul.mubr.bf16.vlgmr.msra.gmra.mrb[4].mxu0 %v1595_v27 }
 0x1cc   :  { %1935 = vmatmul.mubr.bf16.vlgmr.msra.gmra.mrb[4].mxu1 %v1597_v29 }
 0x29e   :  { %v2195_v30 = vpop.f32.mrb[4].mxu0 }
 0x29f   :  { %v2217_v31 = vpop.f32.mrb[4].mxu1  ;;  %v2196_v33 = vpop.f32.mrb[5].mxu0 }
 0x2a0   :  { %v2197_v34 = vadd.f32 %v2196_v33, %v2195_v30  ;;  %v2218_v35 = vpop.f32.mrb[5].mxu1  ;;  %v2198_v36 = vpop.f32.mrb[6].mxu0 }
 0x2a1   :  { %v2219_v37 = vadd.f32 %v2218_v35, %v2217_v31  ;;  %v2220_v38 = vpop.f32.mrb[6].mxu1  ;;  %v2199_v39 = vpop.f32.mrb[7].mxu0 }
 0x2a2   :  { %v1897_v40 = vadd.f32 %v2197_v34, %v2146_v32  ;;  %v2221_v41 = vpop.f32.mrb[7].mxu1 }
 0x2a4   :  { %v1937_v42 = vadd.f32 %v2219_v37, %v1897_v40 }
 0x2a6   :  { %1942 = vst [vmem:[%s2790_s5] sm:$0xff] %v1937_v42 }
 0x2a7   :  { %1947 = vsyncpa [#allocation3], 1 }

</bundles_post_ra>
